<compile_context>
chip_gen: v6e
topology: v6e:2x2x1
jax: 0.10.0
libtpu: 0.0.40
codegen_flags: <defaults>
</compile_context>

<pallas_src>
import functools

import jax
import jax.numpy as jnp
from jax.experimental import pallas as pl
from jax.experimental.pallas import tpu as pltpu

K_IN = 784      # logical input features (Mosaic lane-pads to 896 in VMEM)
H1 = 512
H2 = 256
OUT_PAD = 128   # final 1-wide layer padded to 128 lanes (lane-dense stores)


def _round_up(x, m):
    return ((x + m - 1) // m) * m


def _choose_tiling(B, max_tile):
    """Pick batch tile TB and grid steps.

    * B <= 128: TB = B exactly (block dim equals the array dim -> always legal,
      zero padded work).
    * Otherwise TB is a multiple of 128 dividing round_up(B, 128), capped at
      max_tile, preferring >= 2 grid steps (v7x dual TensorCore) when possible.
      Padded/out-of-bounds rows in the last step are < 128.
    """
    if B <= 128:
        return B, 1
    quant = 128
    bp = _round_up(B, quant)
    m = bp // quant
    cap = max(max_tile // quant, 1)
    divisors = [d for d in range(1, m + 1) if m % d == 0 and d <= cap]
    multi = [d for d in divisors if m // d >= 2]
    d = max(multi) if multi else max(divisors)
    tb = quant * d
    return tb, pl.cdiv(B, tb)


def _discriminator_kernel(x_ref, w1_ref, b1_ref, w2_ref, b2_ref,
                          w3_ref, b3_ref, o_ref):
    # Cast the streamed batch tile to bf16 in VMEM (free on the VPU); all
    # matmuls run bf16 on the MXU with f32 accumulation, biases added in f32.
    x = x_ref[...].astype(jnp.bfloat16)

    # Layer 1: (TB,784) @ (784,512) + b1, LeakyReLU(0.2)
    h1 = jnp.dot(x, w1_ref[...],
                 preferred_element_type=jnp.float32) + b1_ref[...]
    h1 = jnp.where(h1 > 0, h1, 0.2 * h1).astype(jnp.bfloat16)

    # Layer 2: (TB,512) @ (512,256) + b2, LeakyReLU(0.2)
    h2 = jnp.dot(h1, w2_ref[...],
                 preferred_element_type=jnp.float32) + b2_ref[...]
    h2 = jnp.where(h2 > 0, h2, 0.2 * h2).astype(jnp.bfloat16)

    # Layer 3: (TB,256) @ (256,128 padded) + b3, Sigmoid -> bf16 output
    h3 = jnp.dot(h2, w3_ref[...],
                 preferred_element_type=jnp.float32) + b3_ref[...]
    o_ref[...] = jax.nn.sigmoid(h3).astype(o_ref.dtype)


@functools.partial(jax.jit, static_argnames=("max_tile",))
def discriminator_forward(x, kernel_params, max_tile=1024):
    """x: any shape flattening to (B, 784), f32 or bf16. Returns (B, 1) f32."""
    w1, b1, w2, b2, w3p, b3p = kernel_params

    xf = x.reshape(-1, K_IN)          # no dtype conversion / padded copy here
    B = xf.shape[0]

    TB, steps = _choose_tiling(B, max_tile)
    grid = (steps,)
    rows = steps * TB                 # rows actually processed (incl. pad)

    cost = pl.CostEstimate(
        flops=2 * rows * (K_IN * H1 + H1 * H2 + H2 * OUT_PAD),
        transcendentals=rows * OUT_PAD,
        bytes_accessed=(rows * K_IN * xf.dtype.itemsize              # x
                        + 2 * (K_IN * H1 + H1 * H2 + H2 * OUT_PAD)   # weights (bf16)
                        + 4 * (H1 + H2 + OUT_PAD)                    # biases (f32)
                        + rows * OUT_PAD * 2),                       # out (bf16)
    )

    resident = lambda i: (0, 0)  # constant index_map: weights fetched once

    out = pl.pallas_call(
        _discriminator_kernel,
        out_shape=jax.ShapeDtypeStruct((B, OUT_PAD), jnp.bfloat16),
        grid=grid,
        in_specs=[
            pl.BlockSpec((TB, K_IN), lambda i: (i, 0)),   # x tile streams
            pl.BlockSpec((K_IN, H1), resident),           # w1
            pl.BlockSpec((1, H1), resident),              # b1
            pl.BlockSpec((H1, H2), resident),             # w2
            pl.BlockSpec((1, H2), resident),              # b2
            pl.BlockSpec((H2, OUT_PAD), resident),        # w3 (lane-padded)
            pl.BlockSpec((1, OUT_PAD), resident),         # b3 (lane-padded)
        ],
        out_specs=pl.BlockSpec((TB, OUT_PAD), lambda i: (i, 0)),
        compiler_params=pltpu.CompilerParams(
            dimension_semantics=("parallel",),
            vmem_limit_bytes=32 << 20,
        ),
        cost_estimate=cost,
    )(xf, w1, b1, w2, b2, w3p, b3p)

    # Tiny follow-up op on the bf16 buffer: take the real logit column only.
    return out[:, 0:1].astype(jnp.float32)


def init_params(key):
    """Deterministic f32 init mirroring nn.Linear's U(-1/sqrt(fan_in), ...).
    Weights stored as (in_features, out_features)."""
    def linear(k, fan_in, fan_out):
        kw, kb = jax.random.split(k)
        bound = 1.0 / jnp.sqrt(fan_in)
        w = jax.random.uniform(kw, (fan_in, fan_out), jnp.float32, -bound, bound)
        b = jax.random.uniform(kb, (1, fan_out), jnp.float32, -bound, bound)
        return w, b

    k1, k2, k3 = jax.random.split(key, 3)
    w1, b1 = linear(k1, K_IN, H1)
    w2, b2 = linear(k2, H1, H2)
    w3, b3 = linear(k3, H2, 1)
    return (w1, b1, w2, b2, w3, b3)


def pack_params(params):
    """One-time packing: bf16 weights; only the final 1-wide layer is padded
    to 128 lanes (zero columns -> sigmoid(0)=0.5 in lanes 1..127, sliced off).
    Biases stay f32 (added after the f32 accumulation)."""
    w1, b1, w2, b2, w3, b3 = params

    w3p = jnp.zeros((H2, OUT_PAD), jnp.bfloat16).at[:, 0:1].set(
        w3.astype(jnp.bfloat16))
    b3p = jnp.zeros((1, OUT_PAD), jnp.float32).at[:, 0:1].set(b3)

    return (w1.astype(jnp.bfloat16), b1.astype(jnp.float32),
            w2.astype(jnp.bfloat16), b2.astype(jnp.float32),
            w3p, b3p)


def _reference_forward(x, params):
    """Plain-JAX reference mirroring the kernel's bf16-operand / f32-acc math
    and the bf16 output rounding."""
    w1, b1, w2, b2, w3, b3 = params
    h = x.reshape(-1, K_IN).astype(jnp.bfloat16)
    h = jnp.dot(h, w1.astype(jnp.bfloat16),
                preferred_element_type=jnp.float32) + b1
    h = jnp.where(h > 0, h, 0.2 * h).astype(jnp.bfloat16)
    h = jnp.dot(h, w2.astype(jnp.bfloat16),
                preferred_element_type=jnp.float32) + b2
    h = jnp.where(h > 0, h, 0.2 * h).astype(jnp.bfloat16)
    h = jnp.dot(h, w3.astype(jnp.bfloat16),
                preferred_element_type=jnp.float32) + b3
    return jax.nn.sigmoid(h).astype(jnp.bfloat16).astype(jnp.float32)


if __name__ == "__main__":
    key = jax.random.PRNGKey(0)
    k_params, k_x = jax.random.split(key)

    params = init_params(k_params)
    kernel_params = pack_params(params)

    # MNIST-like NCHW input, small batch (flattens to (4, 784)).
    x = jax.random.normal(k_x, (4, 1, 28, 28), jnp.float32)

    out = discriminator_forward(x, kernel_params)
    out = jax.block_until_ready(out)

    ref = _reference_forward(x, params)
    assert out.shape == (4, 1), out.shape
    # bf16 operands + bf16 output rounding: allow ~1 bf16 ulp of a (0,1) value.
    assert bool(jnp.allclose(out, ref, atol=5e-3, rtol=5e-3)), (
        float(jnp.max(jnp.abs(out - ref))))

    print("KERNEL_OK")
</pallas_src>

<mosaic_0001>
module attributes {stable_mosaic.version = 11 : i64} {
  func.func @_discriminator_kernel(%arg0: i32, %arg1: memref<4x784xf32, #tpu.memory_space<vmem>>, %arg2: memref<784x512xbf16, #tpu.memory_space<vmem>>, %arg3: memref<1x512xf32, #tpu.memory_space<vmem>>, %arg4: memref<512x256xbf16, #tpu.memory_space<vmem>>, %arg5: memref<1x256xf32, #tpu.memory_space<vmem>>, %arg6: memref<256x128xbf16, #tpu.memory_space<vmem>>, %arg7: memref<1x128xf32, #tpu.memory_space<vmem>>, %arg8: memref<4x128xbf16, #tpu.memory_space<vmem>>) attributes {dimension_semantics = [#tpu.dimension_semantics<parallel>], iteration_bounds = array<i64: 1>, scalar_prefetch = 0 : i64, scratch_operands = 0 : i64, tpu.core_type = #tpu.core_type<tc>, window_params = [{transform_indices = @transform_0, window_bounds = array<i64: 4, 784>}, {pipeline_mode = #tpu.pipeline_mode<synchronous>, transform_indices = @transform_1, window_bounds = array<i64: 784, 512>}, {pipeline_mode = #tpu.pipeline_mode<synchronous>, transform_indices = @transform_2, window_bounds = array<i64: 1, 512>}, {pipeline_mode = #tpu.pipeline_mode<synchronous>, transform_indices = @transform_3, window_bounds = array<i64: 512, 256>}, {pipeline_mode = #tpu.pipeline_mode<synchronous>, transform_indices = @transform_4, window_bounds = array<i64: 1, 256>}, {pipeline_mode = #tpu.pipeline_mode<synchronous>, transform_indices = @transform_5, window_bounds = array<i64: 256, 128>}, {pipeline_mode = #tpu.pipeline_mode<synchronous>, transform_indices = @transform_6, window_bounds = array<i64: 1, 128>}, {transform_indices = @transform_7, window_bounds = array<i64: 4, 128>}]} {
    %c0 = arith.constant 0 : index
    %c0_0 = arith.constant 0 : index
    %0 = vector.load %arg1[%c0, %c0_0] : memref<4x784xf32, #tpu.memory_space<vmem>>, vector<4x784xf32>
    %1 = arith.truncf %0 : vector<4x784xf32> to vector<4x784xbf16>
    %c0_1 = arith.constant 0 : index
    %c0_2 = arith.constant 0 : index
    %2 = vector.load %arg2[%c0_1, %c0_2] : memref<784x512xbf16, #tpu.memory_space<vmem>>, vector<784x512xbf16>
    %cst = arith.constant dense<0.000000e+00> : vector<4x512xf32>
    %3 = tpu.matmul %1, %2, %cst {dimension_numbers = #tpu.dot_dimension_numbers<[1], [0], [0], [1], [0, 0, 1, 1], [], []>} : vector<4x784xbf16>, vector<784x512xbf16>, vector<4x512xf32> -> vector<4x512xf32>
    %c0_3 = arith.constant 0 : index
    %c0_4 = arith.constant 0 : index
    %4 = vector.load %arg3[%c0_3, %c0_4] : memref<1x512xf32, #tpu.memory_space<vmem>>, vector<1x512xf32>
    %5 = vector.broadcast %4 : vector<1x512xf32> to vector<4x512xf32>
    %6 = arith.addf %3, %5 : vector<4x512xf32>
    %cst_5 = arith.constant 0.000000e+00 : f32
    %7 = vector.broadcast %cst_5 : f32 to vector<4x512xf32>
    %8 = arith.cmpf ogt, %6, %7 : vector<4x512xf32>
    %cst_6 = arith.constant 2.000000e-01 : f32
    %9 = vector.broadcast %cst_6 : f32 to vector<4x512xf32>
    %10 = arith.mulf %9, %6 : vector<4x512xf32>
    %11 = arith.select %8, %6, %10 : vector<4x512xi1>, vector<4x512xf32>
    %12 = arith.truncf %11 : vector<4x512xf32> to vector<4x512xbf16>
    %c0_7 = arith.constant 0 : index
    %c0_8 = arith.constant 0 : index
    %13 = vector.load %arg4[%c0_7, %c0_8] : memref<512x256xbf16, #tpu.memory_space<vmem>>, vector<512x256xbf16>
    %cst_9 = arith.constant dense<0.000000e+00> : vector<4x256xf32>
    %14 = tpu.matmul %12, %13, %cst_9 {dimension_numbers = #tpu.dot_dimension_numbers<[1], [0], [0], [1], [0, 0, 1, 1], [], []>} : vector<4x512xbf16>, vector<512x256xbf16>, vector<4x256xf32> -> vector<4x256xf32>
    %c0_10 = arith.constant 0 : index
    %c0_11 = arith.constant 0 : index
    %15 = vector.load %arg5[%c0_10, %c0_11] : memref<1x256xf32, #tpu.memory_space<vmem>>, vector<1x256xf32>
    %16 = vector.broadcast %15 : vector<1x256xf32> to vector<4x256xf32>
    %17 = arith.addf %14, %16 : vector<4x256xf32>
    %cst_12 = arith.constant 0.000000e+00 : f32
    %18 = vector.broadcast %cst_12 : f32 to vector<4x256xf32>
    %19 = arith.cmpf ogt, %17, %18 : vector<4x256xf32>
    %cst_13 = arith.constant 2.000000e-01 : f32
    %20 = vector.broadcast %cst_13 : f32 to vector<4x256xf32>
    %21 = arith.mulf %20, %17 : vector<4x256xf32>
    %22 = arith.select %19, %17, %21 : vector<4x256xi1>, vector<4x256xf32>
    %23 = arith.truncf %22 : vector<4x256xf32> to vector<4x256xbf16>
    %c0_14 = arith.constant 0 : index
    %c0_15 = arith.constant 0 : index
    %24 = vector.load %arg6[%c0_14, %c0_15] : memref<256x128xbf16, #tpu.memory_space<vmem>>, vector<256x128xbf16>
    %cst_16 = arith.constant dense<0.000000e+00> : vector<4x128xf32>
    %25 = tpu.matmul %23, %24, %cst_16 {dimension_numbers = #tpu.dot_dimension_numbers<[1], [0], [0], [1], [0, 0, 1, 1], [], []>} : vector<4x256xbf16>, vector<256x128xbf16>, vector<4x128xf32> -> vector<4x128xf32>
    %c0_17 = arith.constant 0 : index
    %c0_18 = arith.constant 0 : index
    %26 = vector.load %arg7[%c0_17, %c0_18] : memref<1x128xf32, #tpu.memory_space<vmem>>, vector<1x128xf32>
    %27 = vector.broadcast %26 : vector<1x128xf32> to vector<4x128xf32>
    %28 = arith.addf %25, %27 : vector<4x128xf32>
    %29 = arith.negf %28 : vector<4x128xf32>
    %30 = math.exp %29 : vector<4x128xf32>
    %cst_19 = arith.constant 1.000000e+00 : f32
    %31 = vector.broadcast %cst_19 : f32 to vector<4x128xf32>
    %32 = arith.addf %31, %30 : vector<4x128xf32>
    %33 = arith.divf %31, %32 : vector<4x128xf32>
    %34 = arith.truncf %33 : vector<4x128xf32> to vector<4x128xbf16>
    %c0_20 = arith.constant 0 : index
    %c0_21 = arith.constant 0 : index
    %35 = vector.load %arg8[%c0_20, %c0_21] : memref<4x128xbf16, #tpu.memory_space<vmem>>, vector<4x128xbf16>
    tpu.vector_store %arg8[%c0_20, %c0_21], %34 {strides = array<i32>} : memref<4x128xbf16, #tpu.memory_space<vmem>>, vector<4x128xbf16>,
    return
  }
  func.func @transform_0(%arg0: i32) -> (i32, i32) {
    %c0_i32 = arith.constant 0 : i32
    %c0_i32_0 = arith.constant 0 : i32
    return %arg0, %c0_i32 : i32, i32
  }
  func.func @transform_1(%arg0: i32) -> (i32, i32) {
    %c0_i32 = arith.constant 0 : i32
    %c0_i32_0 = arith.constant 0 : i32
    %c0_i32_1 = arith.constant 0 : i32
    return %c0_i32, %c0_i32_0 : i32, i32
  }
  func.func @transform_2(%arg0: i32) -> (i32, i32) {
    %c0_i32 = arith.constant 0 : i32
    %c0_i32_0 = arith.constant 0 : i32
    %c0_i32_1 = arith.constant 0 : i32
    return %c0_i32, %c0_i32_0 : i32, i32
  }
  func.func @transform_3(%arg0: i32) -> (i32, i32) {
    %c0_i32 = arith.constant 0 : i32
    %c0_i32_0 = arith.constant 0 : i32
    %c0_i32_1 = arith.constant 0 : i32
    return %c0_i32, %c0_i32_0 : i32, i32
  }
  func.func @transform_4(%arg0: i32) -> (i32, i32) {
    %c0_i32 = arith.constant 0 : i32
    %c0_i32_0 = arith.constant 0 : i32
    %c0_i32_1 = arith.constant 0 : i32
    return %c0_i32, %c0_i32_0 : i32, i32
  }
  func.func @transform_5(%arg0: i32) -> (i32, i32) {
    %c0_i32 = arith.constant 0 : i32
    %c0_i32_0 = arith.constant 0 : i32
    %c0_i32_1 = arith.constant 0 : i32
    return %c0_i32, %c0_i32_0 : i32, i32
  }
  func.func @transform_6(%arg0: i32) -> (i32, i32) {
    %c0_i32 = arith.constant 0 : i32
    %c0_i32_0 = arith.constant 0 : i32
    %c0_i32_1 = arith.constant 0 : i32
    return %c0_i32, %c0_i32_0 : i32, i32
  }
  func.func @transform_7(%arg0: i32) -> (i32, i32) {
    %c0_i32 = arith.constant 0 : i32
    %c0_i32_0 = arith.constant 0 : i32
    return %arg0, %c0_i32 : i32, i32
  }
}

</mosaic_0001>

<bundles_post_ra>
// kernel: discriminator_forward.1
= control target key start
LH: loop header
LB: loop body
LE: loop exit
PB: predicated region body
PF: predicated region fallthrough
CT: control target
= control target key end

     0   :  { %12 = vsyncpa [#allocation3], 0  ;;  %s3239_s0 = inlined_call_operand.vmem [shape: f32[4,784], index: 0, kind: input, shape index: {}]   ;;  %s3240_s1 = inlined_call_operand.hbm [shape: bf16[784,512], index: 1, kind: input, shape index: {}]   ;;  %s3241_s2 = inlined_call_operand.vmem [shape: f32[1,512], index: 2, kind: input, shape index: {}]   ;;  %s3242_s3 = inlined_call_operand.hbm [shape: bf16[512,256], index: 3, kind: input, shape index: {}]   ;;  %s3243_s4 = inlined_call_operand.vmem [shape: f32[1,256], index: 4, kind: input, shape index: {}]   ;;  %s3244_s5 = inlined_call_operand.vmem [shape: bf16[256,128], index: 5, kind: input, shape index: {}]   ;;  %s3245_s6 = inlined_call_operand.vmem [shape: f32[1,128], index: 6, kind: input, shape index: {}]   ;;  %s3246_s7 = inlined_call_operand.vmem [shape: bf16[4,128], index: 7, kind: output, shape index: {}]  }
   0x1   :  { %13 = vsyncpa [#allocation5], 0  ;;  %s3062_s24 = smov [#allocation2]  }
   0x2   :  { %s21_s25 = sshll.u32 %s3062_s24, 4  ;;  %s22_s25 = int_to_ptr.vmem [resolvable:$true] %s21_s25 }
   0x3   :  { %s3026_s26 = scalar_lea.vmem %s22_s25, 25088  ;;  %p3031_p1 = scmp.lt.s32.totalorder %s22_s25, %s22_s25 }
   0x4   :  { %p3027_p0 = scmp.ne.s32.totalorder %s22_s25, %s3026_s26  ;;  %p3032_p2 = scmp.lt.s32.totalorder %s3026_s26, %s3026_s26 }
   0x6   :  { %p3033_p3 = por %p3032_p2, %p3031_p1 }
   0x8   :  { %p3034_p4 = pnand %p3033_p3, %p3027_p0 }
   0xa   :  { %3037 = shalt.err (!%p3034_p4)
}
   0xb   :  { %s3063_s27 = smov 256   ;;  %s3064_s28 = smov 16  }
   0xc   :  { %27 = dma.hbm_to_vmem [thread:$0]  %s3240_s1, 25088, %s22_s25, [#allocation3], %s3063_s27, %s3063_s27, %s3064_s28  }
   0xd   :  { %s3065_s8 = smov [#allocation4]  }
   0xe   :  { %s35_s9 = sshll.u32 %s3065_s8, 4  ;;  %s36_s9 = int_to_ptr.vmem [resolvable:$true] %s35_s9 }
   0xf   :  { %s3046_s10 = scalar_lea.vmem %s36_s9, 8192  ;;  %p3051_p6 = scmp.lt.s32.totalorder %s36_s9, %s36_s9 }
  0x10   :  { %p3047_p5 = scmp.ne.s32.totalorder %s36_s9, %s3046_s10  ;;  %p3052_p7 = scmp.lt.s32.totalorder %s3046_s10, %s3046_s10 }
  0x12   :  { %p3053_p8 = por %p3052_p7, %p3051_p6 }
  0x14   :  { %p3054_p9 = pnand %p3053_p8, %p3047_p5 }
  0x16   :  { %3057 = shalt.err (!%p3054_p9)
}
  0x17   :  { %s3066_s11 = smov 128   ;;  %s3067_s12 = smov 8  }
  0x18   :  { %41 = dma.hbm_to_vmem [thread:$0]  %s3242_s3, 8192, %s36_s9, [#allocation5], %s3066_s11, %s3066_s11, %s3067_s12  }
  0x19   :  { %3058 = dma.done.wait [#allocation3], 25088  }
  0x1a   :  { %3059 = vsyncadd [#allocation3], 4294942208 }
  0x1b   :  { %3060 = dma.done.wait [#allocation5], 8192  }
  0x1c   :  { %3061 = vsyncadd [#allocation5], 4294959104  ;;  %v2605_v0 = vld [vmem:[#allocation2 + $0xe4] ss:$16 sps:$4 sm:$0xff]   ;;  %v2609_v2 = vld [vmem:[#allocation2 + $0xe0] ss:$16 sps:$4 sm:$0xff]  }
  0x1d   :  { %v2607_v1 = vld [vmem:[#allocation2 + $0x2e4] ss:$16 sps:$4 sm:$0xff]   ;;  %1277 = vmatprep.subr.bf16.mxu0 %v2605_v0  ;;  %v2610_v3 = vld [vmem:[#allocation2 + $0x2e0] ss:$16 sps:$4 sm:$0xff]   ;;  %v56_v48 = vld [vmem:[%s3239_s0 + $0x8] sm:$0xff]  ;;  %vm1273_vm0 = vcmask 130048  }
  0x1e   :  { %1318 = vmatprep.subr.bf16.mxu1 %v2607_v1  ;;  %v2611_v4 = vld [vmem:[#allocation2 + $0xc4] ss:$16 sps:$4 sm:$0xff]   ;;  %1278 = vmatpush1.bf16.msra.mxu0 %v2609_v2  ;;  %v2615_v6 = vld [vmem:[#allocation2 + $0xc0] ss:$16 sps:$4 sm:$0xff]   ;;  %v63_v51 = vcombine.high %v56_v48, %v56_v48 }
  0x1f   :  { %1319 = vmatpush1.bf16.msra.mxu1 %v2610_v3  ;;  %v2613_v5 = vld [vmem:[#allocation2 + $0x2c4] ss:$16 sps:$4 sm:$0xff]   ;;  %1279 = vmatprep.subr.bf16.mxu0 %v2611_v4  ;;  %v2616_v7 = vld [vmem:[#allocation2 + $0x2c0] ss:$16 sps:$4 sm:$0xff]  }
  0x20   :  { %1320 = vmatprep.subr.bf16.mxu1 %v2613_v5  ;;  %v2617_v8 = vld [vmem:[#allocation2 + $0xa4] ss:$16 sps:$4 sm:$0xff]   ;;  %v2621_v10 = vld [vmem:[#allocation2 + $0xa0] ss:$16 sps:$4 sm:$0xff]   ;;  %v3123_v55 = vpack.c.bf16 %v63_v51, %v63_v51 }
  0x21   :  { %v2619_v9 = vld [vmem:[#allocation2 + $0x2a4] ss:$16 sps:$4 sm:$0xff]   ;;  %v2622_v11 = vld [vmem:[#allocation2 + $0x2a0] ss:$16 sps:$4 sm:$0xff]  }
  0x22   :  { %1280 = vmatpush1.bf16.msra.mxu0 %v2615_v6  ;;  %v2623_v12 = vld [vmem:[#allocation2 + $0x84] ss:$16 sps:$4 sm:$0xff]   ;;  %v2627_v14 = vld [vmem:[#allocation2 + $0x80] ss:$16 sps:$4 sm:$0xff]   ;;  %1350 = vmatprep.mubr.bf16.mxu1 %v3123_v55 }
  0x23   :  { %1321 = vmatpush1.bf16.msra.mxu1 %v2616_v7  ;;  %1281 = vmatprep.subr.bf16.mxu0 %v2617_v8  ;;  %v2625_v13 = vld [vmem:[#allocation2 + $0x284] ss:$16 sps:$4 sm:$0xff]   ;;  %v2628_v15 = vld [vmem:[#allocation2 + $0x280] ss:$16 sps:$4 sm:$0xff]  }
  0x24   :  { %1322 = vmatprep.subr.bf16.mxu1 %v2619_v9  ;;  %v2629_v16 = vld [vmem:[#allocation2 + $0x64] ss:$16 sps:$4 sm:$0xff]   ;;  %v2633_v18 = vld [vmem:[#allocation2 + $0x60] ss:$16 sps:$4 sm:$0xff]   ;;  %v3129_v9 = vpack.c.bf16 %v56_v48, %v56_v48  ;;  %v2756_v48 = vld [vmem:[#allocation2 + $0xc] ss:$16 sps:$4 sm:$0xff]  }
  0x25   :  { %v2631_v17 = vld [vmem:[#allocation2 + $0x264] ss:$16 sps:$4 sm:$0xff]   ;;  %v2634_v19 = vld [vmem:[#allocation2 + $0x260] ss:$16 sps:$4 sm:$0xff]  }
  0x26   :  { %1282 = vmatpush1.bf16.msra.mxu0 %v2621_v10  ;;  %v2635_v20 = vld [vmem:[#allocation2 + $0x44] ss:$16 sps:$4 sm:$0xff]   ;;  %v2639_v22 = vld [vmem:[#allocation2 + $0x40] ss:$16 sps:$4 sm:$0xff]  }
  0x27   :  { %1323 = vmatpush1.bf16.msra.mxu1 %v2622_v11  ;;  %1283 = vmatprep.subr.bf16.mxu0 %v2623_v12  ;;  %v2637_v21 = vld [vmem:[#allocation2 + $0x244] ss:$16 sps:$4 sm:$0xff]   ;;  %v2640_v23 = vld [vmem:[#allocation2 + $0x240] ss:$16 sps:$4 sm:$0xff]  }
  0x28   :  { %1324 = vmatprep.subr.bf16.mxu1 %v2625_v13  ;;  %v2641_v24 = vld [vmem:[#allocation2 + $0x24] ss:$16 sps:$4 sm:$0xff]   ;;  %v2645_v26 = vld [vmem:[#allocation2 + $0x20] ss:$16 sps:$4 sm:$0xff]   ;;  %v2714_v13 = vld [vmem:[#allocation2 + $0xec] ss:$16 sps:$4 sm:$0xff]  }
  0x29   :  { %v2643_v25 = vld [vmem:[#allocation2 + $0x224] ss:$16 sps:$4 sm:$0xff]   ;;  %v2646_v27 = vld [vmem:[#allocation2 + $0x220] ss:$16 sps:$4 sm:$0xff]  }
  0x2a   :  { %1284 = vmatpush1.bf16.msra.mxu0 %v2627_v14  ;;  %v2647_v28 = vld [vmem:[#allocation2 + $0x4] ss:$16 sps:$4 sm:$0xff]   ;;  %v2651_v30 = vld [vmem:[#allocation2] ss:$16 sps:$4 sm:$0xff]  }
  0x2b   :  { %1325 = vmatpush1.bf16.msra.mxu1 %v2628_v15  ;;  %1285 = vmatprep.subr.bf16.mxu0 %v2629_v16  ;;  %v2649_v29 = vld [vmem:[#allocation2 + $0x204] ss:$16 sps:$4 sm:$0xff]   ;;  %v2652_v31 = vld [vmem:[#allocation2 + $0x200] ss:$16 sps:$4 sm:$0xff]   ;;  %v58_v15 = vld [vmem:[%s3239_s0 + $0x18] sm:$0xf] }
  0x2c   :  { %1326 = vmatprep.subr.bf16.mxu1 %v2631_v17  ;;  %v2653_v32 = vld [vmem:[#allocation2 + $0x1e4] ss:$16 sps:$4 sm:$0xff]   ;;  %v2657_v34 = vld [vmem:[#allocation2 + $0x1e0] ss:$16 sps:$4 sm:$0xff]   ;;  %v3068_v16 = vmov 0  }
  0x2d   :  { %v2655_v33 = vld [vmem:[#allocation2 + $0x3e4] ss:$16 sps:$4 sm:$0xff]   ;;  %v2658_v35 = vld [vmem:[#allocation2 + $0x3e0] ss:$16 sps:$4 sm:$0xff]  }
  0x2e   :  { %1286 = vmatpush1.bf16.msra.mxu0 %v2633_v18  ;;  %v2659_v36 = vld [vmem:[#allocation2 + $0x1c4] ss:$16 sps:$4 sm:$0xff]   ;;  %v2663_v38 = vld [vmem:[#allocation2 + $0x1c0] ss:$16 sps:$4 sm:$0xff]   ;;  %v2712_v18 = vld [vmem:[#allocation2 + $0xe8] ss:$16 sps:$4 sm:$0xff]  }
  0x2f   :  { %1327 = vmatpush1.bf16.msra.mxu1 %v2634_v19  ;;  %1287 = vmatprep.subr.bf16.mxu0 %v2635_v20  ;;  %v2661_v37 = vld [vmem:[#allocation2 + $0x3c4] ss:$16 sps:$4 sm:$0xff]   ;;  %v2664_v39 = vld [vmem:[#allocation2 + $0x3c0] ss:$16 sps:$4 sm:$0xff]   ;;  %v3137_v19 = vpack.c.bf16 %v58_v15, %v58_v15  ;;  %v2799_v15 = vld [vmem:[#allocation2 + $0x12c] ss:$16 sps:$4 sm:$0xff]  }
  0x30   :  { %1328 = vmatprep.subr.bf16.mxu1 %v2637_v21  ;;  %v2665_v40 = vld [vmem:[#allocation2 + $0x1a4] ss:$16 sps:$4 sm:$0xff]   ;;  %v2669_v42 = vld [vmem:[#allocation2 + $0x1a0] ss:$16 sps:$4 sm:$0xff]   ;;  %v2720_v21 = vld [vmem:[#allocation2 + $0xcc] ss:$16 sps:$4 sm:$0xff]  }
  0x31   :  { %v2667_v41 = vld [vmem:[#allocation2 + $0x3a4] ss:$16 sps:$4 sm:$0xff]   ;;  %v2670_v43 = vld [vmem:[#allocation2 + $0x3a0] ss:$16 sps:$4 sm:$0xff]  }
  0x32   :  { %1288 = vmatpush1.bf16.msra.mxu0 %v2639_v22  ;;  %v2671_v44 = vld [vmem:[#allocation2 + $0x184] ss:$16 sps:$4 sm:$0xff]   ;;  %v2675_v49 = vld [vmem:[#allocation2 + $0x180] ss:$16 sps:$4 sm:$0xff]  }
  0x33   :  { %1329 = vmatpush1.bf16.msra.mxu1 %v2640_v23  ;;  %1289 = vmatprep.subr.bf16.mxu0 %v2641_v24  ;;  %v2673_v45 = vld [vmem:[#allocation2 + $0x384] ss:$16 sps:$4 sm:$0xff]   ;;  %v2676_v50 = vld [vmem:[#allocation2 + $0x380] ss:$16 sps:$4 sm:$0xff]   ;;  %v2718_v23 = vld [vmem:[#allocation2 + $0xc8] ss:$16 sps:$4 sm:$0xff]  }
  0x34   :  { %1330 = vmatprep.subr.bf16.mxu1 %v2643_v25  ;;  %v55_v46 = vld [vmem:[%s3239_s0] sm:$0xff]  ;;  %v2726_v25 = vld [vmem:[#allocation2 + $0xac] ss:$16 sps:$4 sm:$0xff]  }
  0x35   :  { %v62_v47 = vcombine.high %v55_v46, %v55_v46  ;;  %v2677_v52 = vld [vmem:[#allocation2 + $0x164] ss:$16 sps:$4 sm:$0xff]   ;;  %v2681_v56 = vld [vmem:[#allocation2 + $0x160] ss:$16 sps:$4 sm:$0xff]   ;;  %v3127_v8 = vpack.c.bf16 %v55_v46, %v55_v46  ;;  %v2748_v46 = vld [vmem:[#allocation2 + $0x28] ss:$16 sps:$4 sm:$0xff]  }
  0x36   :  { %1290 = vmatpush1.bf16.msra.mxu0 %v2645_v26  ;;  %v2679_v53 = vld [vmem:[#allocation2 + $0x364] ss:$16 sps:$4 sm:$0xff]   ;;  %v2682_v57 = vld [vmem:[#allocation2 + $0x360] ss:$16 sps:$4 sm:$0xff]  }
  0x37   :  { %1331 = vmatpush1.bf16.msra.mxu1 %v2646_v27  ;;  %1291 = vmatprep.subr.bf16.mxu0 %v2647_v28  ;;  %v3121_v54 = vpack.c.bf16 %v62_v47, %v62_v47  ;;  %v2683_v58 = vld [vmem:[#allocation2 + $0x144] ss:$16 sps:$4 sm:$0xff]   ;;  %v2687_v60 = vld [vmem:[#allocation2 + $0x140] ss:$16 sps:$4 sm:$0xff]   ;;  %v2724_v27 = vld [vmem:[#allocation2 + $0xa8] ss:$16 sps:$4 sm:$0xff]  }
  0x38   :  { %1332 = vmatprep.subr.bf16.mxu1 %v2649_v29  ;;  %v2685_v59 = vld [vmem:[#allocation2 + $0x344] ss:$16 sps:$4 sm:$0xff]   ;;  %v2688_v61 = vld [vmem:[#allocation2 + $0x340] ss:$16 sps:$4 sm:$0xff]   ;;  %v2732_v29 = vld [vmem:[#allocation2 + $0x8c] ss:$16 sps:$4 sm:$0xff]  }
  0x39   :  { %1309 = vmatprep.mubr.bf16.mxu0 %v3121_v54  ;;  %v2689_v62 = vld [vmem:[#allocation2 + $0x124] ss:$16 sps:$4 sm:$0xff]   ;;  %v2693_v0 = vld [vmem:[#allocation2 + $0x120] ss:$16 sps:$4 sm:$0xff]  }
  0x3a   :  { %1292 = vmatpush1.bf16.msra.mxu0 %v2651_v30  ;;  %v2691_v63 = vld [vmem:[#allocation2 + $0x324] ss:$16 sps:$4 sm:$0xff]   ;;  %v2694_v1 = vld [vmem:[#allocation2 + $0x320] ss:$16 sps:$4 sm:$0xff]  }
  0x3b   :  { %1333 = vmatpush1.bf16.msra.mxu1 %v2652_v31  ;;  %1293 = vmatprep.subr.bf16.mxu0 %v2653_v32  ;;  %v2695_v2 = vld [vmem:[#allocation2 + $0x104] ss:$16 sps:$4 sm:$0xff]   ;;  %v2699_v4 = vld [vmem:[#allocation2 + $0x100] ss:$16 sps:$4 sm:$0xff]   ;;  %v2730_v31 = vld [vmem:[#allocation2 + $0x88] ss:$16 sps:$4 sm:$0xff]  }
  0x3c   :  { %1334 = vmatprep.subr.bf16.mxu1 %v2655_v33  ;;  %v2697_v3 = vld [vmem:[#allocation2 + $0x304] ss:$16 sps:$4 sm:$0xff]   ;;  %v2700_v5 = vld [vmem:[#allocation2 + $0x300] ss:$16 sps:$4 sm:$0xff]   ;;  %v2738_v33 = vld [vmem:[#allocation2 + $0x6c] ss:$16 sps:$4 sm:$0xff]  }
  0x3d   :  { %v2705_v6 = vld [vmem:[#allocation2 + $0x4e4] ss:$16 sps:$4 sm:$0xff]   ;;  %v2703_v10 = vld [vmem:[#allocation2 + $0x4e0] ss:$16 sps:$4 sm:$0xff]  }
  0x3e   :  { %1294 = vmatpush2.bf16.msra.mxu0 %v2657_v34  ;;  %v2708_v7 = vld [vmem:[#allocation2 + $0x604] ss:$16 sps:$4 sm:$0xff]   ;;  %v2706_v11 = vld [vmem:[#allocation2 + $0x600] ss:$16 sps:$4 sm:$0xff]  }
  0x3f   :  { %1335 = vmatpush2.bf16.msra.mxu1 %v2658_v35  ;;  %1295 = vmatprep.subr.bf16.mxu0 %v2659_v36  ;;  %v2711_v12 = vld [vmem:[#allocation2 + $0x4c4] ss:$16 sps:$4 sm:$0xff]   ;;  %v2709_v14 = vld [vmem:[#allocation2 + $0x4c0] ss:$16 sps:$4 sm:$0xff]  }
  0x40   :  { %1336 = vmatprep.subr.bf16.mxu1 %v2661_v37  ;;  %v2717_v17 = vld [vmem:[#allocation2 + $0x4a4] ss:$16 sps:$4 sm:$0xff]   ;;  %v2715_v20 = vld [vmem:[#allocation2 + $0x4a0] ss:$16 sps:$4 sm:$0xff]   ;;  %v2736_v37 = vld [vmem:[#allocation2 + $0x68] ss:$16 sps:$4 sm:$0xff]  }
  0x41   :  { %v2723_v22 = vld [vmem:[#allocation2 + $0x484] ss:$16 sps:$4 sm:$0xff]   ;;  %v2721_v24 = vld [vmem:[#allocation2 + $0x480] ss:$16 sps:$4 sm:$0xff]  }
  0x42   :  { %1296 = vmatpush2.bf16.msra.mxu0 %v2663_v38  ;;  %v2729_v26 = vld [vmem:[#allocation2 + $0x464] ss:$16 sps:$4 sm:$0xff]   ;;  %v2727_v28 = vld [vmem:[#allocation2 + $0x460] ss:$16 sps:$4 sm:$0xff]  }
  0x43   :  { %1337 = vmatpush2.bf16.msra.mxu1 %v2664_v39  ;;  %1297 = vmatprep.subr.bf16.mxu0 %v2665_v40  ;;  %v2735_v30 = vld [vmem:[#allocation2 + $0x444] ss:$16 sps:$4 sm:$0xff]   ;;  %v2733_v32 = vld [vmem:[#allocation2 + $0x440] ss:$16 sps:$4 sm:$0xff]   ;;  %v2744_v39 = vld [vmem:[#allocation2 + $0x4c] ss:$16 sps:$4 sm:$0xff]  }
  0x44   :  { %1338 = vmatprep.subr.bf16.mxu1 %v2667_v41  ;;  %v2741_v34 = vld [vmem:[#allocation2 + $0x424] ss:$16 sps:$4 sm:$0xff]   ;;  %v2739_v38 = vld [vmem:[#allocation2 + $0x420] ss:$16 sps:$4 sm:$0xff]  }
  0x45   :  { %v3145_v35 = vld [vmem:[%s3239_s0 + $0x10] sm:$0xff] }
  0x46   :  { %1298 = vmatpush2.bf16.msra.mxu0 %v2669_v42  ;;  %v64_v36 = vcombine.high %v3145_v35, %v3145_v35  ;;  %v2747_v41 = vld [vmem:[#allocation2 + $0x404] ss:$16 sps:$4 sm:$0xff]   ;;  %v2742_v42 = vld [vmem:[#allocation2 + $0x48] ss:$16 sps:$4 sm:$0xff]   ;;  %v2751_v47 = vld [vmem:[#allocation2 + $0x5e0] ss:$16 sps:$4 sm:$0xff]  }
  0x47   :  { %1339 = vmatpush2.bf16.msra.mxu1 %v2670_v43  ;;  %1299 = vmatprep.subr.bf16.mxu0 %v2671_v44  ;;  %v2745_v43 = vld [vmem:[#allocation2 + $0x400] ss:$16 sps:$4 sm:$0xff]   ;;  %v2750_v44 = vld [vmem:[#allocation2 + $0x2c] ss:$16 sps:$4 sm:$0xff]  }
  0x48   :  { %1340 = vmatprep.subr.bf16.mxu1 %v2673_v45  ;;  %v3149_v40 = vpack.c.bf16 %v64_v36, %v64_v36  ;;  %v2753_v45 = vld [vmem:[#allocation2 + $0x5e4] ss:$16 sps:$4 sm:$0xff]   ;;  %v2757_v51 = vld [vmem:[#allocation2 + $0x5c0] ss:$16 sps:$4 sm:$0xff]   ;;  %v2821_v36 = vld [vmem:[#allocation2 + $0x4a8] ss:$16 sps:$4 sm:$0xff]  }
  0x4a   :  { %1300 = vmatpush2.bf16.msra.mxu0 %v2675_v49  ;;  %v2759_v49 = vld [vmem:[#allocation2 + $0x5c4] ss:$16 sps:$4 sm:$0xff]  }
  0x4b   :  { %1341 = vmatpush2.bf16.msra.mxu1 %v2676_v50  ;;  %1301 = vmatprep.subr.bf16.mxu0 %v2677_v52  ;;  %v2754_v50 = vld [vmem:[#allocation2 + $0x8] ss:$16 sps:$4 sm:$0xff]   ;;  %v2762_v52 = vld [vmem:[#allocation2 + $0x1ec] ss:$16 sps:$4 sm:$0xff]  }
  0x4c   :  { %1342 = vmatprep.subr.bf16.mxu1 %v2679_v53  ;;  %v2765_v53 = vld [vmem:[#allocation2 + $0x5a4] ss:$16 sps:$4 sm:$0xff]  }
  0x4e   :  { %1302 = vmatpush2.bf16.msra.mxu0 %v2681_v56  ;;  %v2763_v56 = vld [vmem:[#allocation2 + $0x5a0] ss:$16 sps:$4 sm:$0xff]  }
  0x4f   :  { %1343 = vmatpush2.bf16.msra.mxu1 %v2682_v57  ;;  %1303 = vmatprep.subr.bf16.mxu0 %v2683_v58  ;;  %v2768_v57 = vld [vmem:[#allocation2 + $0x1cc] ss:$16 sps:$4 sm:$0xff]   ;;  %v2771_v58 = vld [vmem:[#allocation2 + $0x584] ss:$16 sps:$4 sm:$0xff]  }
  0x50   :  { %1344 = vmatprep.subr.bf16.mxu1 %v2685_v59  ;;  %v2766_v59 = vld [vmem:[#allocation2 + $0x1c8] ss:$16 sps:$4 sm:$0xff]  }
  0x52   :  { %1304 = vmatpush2.bf16.msra.mxu0 %v2687_v60  ;;  %v2769_v60 = vld [vmem:[#allocation2 + $0x580] ss:$16 sps:$4 sm:$0xff]  }
  0x53   :  { %1345 = vmatpush2.bf16.msra.mxu1 %v2688_v61  ;;  %1305 = vmatprep.subr.bf16.mxu0 %v2689_v62  ;;  %v2774_v61 = vld [vmem:[#allocation2 + $0x1ac] ss:$16 sps:$4 sm:$0xff]   ;;  %v2777_v62 = vld [vmem:[#allocation2 + $0x564] ss:$16 sps:$4 sm:$0xff]  }
  0x54   :  { %1346 = vmatprep.subr.bf16.mxu1 %v2691_v63  ;;  %v2772_v63 = vld [vmem:[#allocation2 + $0x1a8] ss:$16 sps:$4 sm:$0xff]  }
  0x56   :  { %1306 = vmatpush2.bf16.msra.mxu0 %v2693_v0  ;;  %v2775_v0 = vld [vmem:[#allocation2 + $0x560] ss:$16 sps:$4 sm:$0xff]  }
  0x57   :  { %1347 = vmatpush2.bf16.msra.mxu1 %v2694_v1  ;;  %1307 = vmatprep.subr.bf16.mxu0 %v2695_v2  ;;  %v2780_v1 = vld [vmem:[#allocation2 + $0x18c] ss:$16 sps:$4 sm:$0xff]   ;;  %v2783_v2 = vld [vmem:[#allocation2 + $0x544] ss:$16 sps:$4 sm:$0xff]  }
  0x58   :  { %1348 = vmatprep.subr.bf16.mxu1 %v2697_v3  ;;  %v2778_v3 = vld [vmem:[#allocation2 + $0x188] ss:$16 sps:$4 sm:$0xff]  }
  0x5a   :  { %1308 = vmatpush2.bf16.msra.mxu0 %v2699_v4  ;;  %v2781_v4 = vld [vmem:[#allocation2 + $0x540] ss:$16 sps:$4 sm:$0xff]  }
  0x5b   :  { %1349 = vmatpush2.bf16.msra.mxu1 %v2700_v5  ;;  %1359 = vmatprep.subr.bf16.mxu0 %v2705_v6  ;;  %v2786_v5 = vld [vmem:[#allocation2 + $0x16c] ss:$16 sps:$4 sm:$0xff]   ;;  %v2789_v6 = vld [vmem:[#allocation2 + $0x524] ss:$16 sps:$4 sm:$0xff]  }
  0x5c   :  { %1414 = vmatprep.subr.bf16.mxu1 %v2708_v7  ;;  %v2784_v7 = vld [vmem:[#allocation2 + $0x168] ss:$16 sps:$4 sm:$0xff]  }
  0x5d   :  { %1310 = vmatmul.mubr.bf16.vlgmr.msra.gmra.mxu0 %v3127_v8 }
  0x5e   :  { %1351 = vmatmul.mubr.bf16.vlgmr.msra.gmra.mxu1 %v3129_v9  ;;  %1360 = vmatpush1.bf16.msra.mxu0 %v2703_v10  ;;  %v2787_v10 = vld [vmem:[#allocation2 + $0x520] ss:$16 sps:$4 sm:$0xff]  }
  0x5f   :  { %1415 = vmatpush1.bf16.msra.mxu1 %v2706_v11  ;;  %1361 = vmatprep.subr.bf16.mxu0 %v2711_v12  ;;  %v2792_v11 = vld [vmem:[#allocation2 + $0x14c] ss:$16 sps:$4 sm:$0xff]   ;;  %v2795_v12 = vld [vmem:[#allocation2 + $0x504] ss:$16 sps:$4 sm:$0xff]  }
  0x60   :  { %1432 = vmatprep.mubr.bf16.mxu1 %v3068_v16  ;;  %1441 = vmatprep.subr.bf16.mxu1 %v2714_v13  ;;  %v2790_v13 = vld [vmem:[#allocation2 + $0x148] ss:$16 sps:$4 sm:$0xff]  }
  0x61   :  { %1391 = vmatprep.mubr.bf16.mxu0 %v3149_v40 }
  0x62   :  { %1362 = vmatpush1.bf16.msra.mxu0 %v2709_v14  ;;  %v2793_v14 = vld [vmem:[#allocation2 + $0x500] ss:$16 sps:$4 sm:$0xff]  }
  0x63   :  { %1363 = vmatprep.subr.bf16.mxu0 %v2717_v17  ;;  %v2802_v17 = vld [vmem:[#allocation2 + $0x2ec] ss:$16 sps:$4 sm:$0xff]  }
  0x66   :  { %2492 = vmatmul.mubr.msk.bf16.vlgmr.msra.gmra.mxu1 %vm1273_vm0, %v3137_v19  ;;  %1364 = vmatpush1.bf16.msra.mxu0 %v2715_v20  ;;  %v2797_v20 = vld [vmem:[#allocation2 + $0x128] ss:$16 sps:$4 sm:$0xff]  }
  0x67   :  { %1442 = vmatpush1.bf16.msra.mxu1 %v2712_v18  ;;  %1365 = vmatprep.subr.bf16.mxu0 %v2723_v22  ;;  %v3154_v18 = vpack.c.bf16 %v3145_v35, %v3145_v35  ;;  %v2805_v22 = vld [vmem:[#allocation2 + $0x10c] ss:$16 sps:$4 sm:$0xff]  }
  0x68   :  { %1443 = vmatprep.subr.bf16.mxu1 %v2720_v21  ;;  %1473 = vmatprep.mubr.bf16.mxu1 %v3121_v54  ;;  %v2760_v54 = vld [vmem:[#allocation2 + $0x1e8] ss:$16 sps:$4 sm:$0xff]   ;;  %v2826_v35 = vld [vmem:[#allocation2 + $0x26c] ss:$16 sps:$4 sm:$0xff]  }
  0x69   :  { %v2800_v21 = vld [vmem:[#allocation2 + $0x2e8] ss:$16 sps:$4 sm:$0xff]  }
  0x6a   :  { %1366 = vmatpush1.bf16.msra.mxu0 %v2721_v24  ;;  %v2803_v24 = vld [vmem:[#allocation2 + $0x108] ss:$16 sps:$4 sm:$0xff]  }
  0x6b   :  { %1444 = vmatpush1.bf16.msra.mxu1 %v2718_v23  ;;  %1367 = vmatprep.subr.bf16.mxu0 %v2729_v26  ;;  %v2808_v23 = vld [vmem:[#allocation2 + $0x2cc] ss:$16 sps:$4 sm:$0xff]  }
  0x6c   :  { %1445 = vmatprep.subr.bf16.mxu1 %v2726_v25  ;;  %v2806_v25 = vld [vmem:[#allocation2 + $0x2c8] ss:$16 sps:$4 sm:$0xff]   ;;  %v2811_v26 = vld [vmem:[#allocation2 + $0x4ec] ss:$16 sps:$4 sm:$0xff]  }
  0x6e   :  { %1368 = vmatpush1.bf16.msra.mxu0 %v2727_v28  ;;  %v2809_v28 = vld [vmem:[#allocation2 + $0x4e8] ss:$16 sps:$4 sm:$0xff]  }
  0x6f   :  { %1446 = vmatpush1.bf16.msra.mxu1 %v2724_v27  ;;  %1369 = vmatprep.subr.bf16.mxu0 %v2735_v30  ;;  %v2814_v27 = vld [vmem:[#allocation2 + $0x2ac] ss:$16 sps:$4 sm:$0xff]  }
  0x70   :  { %1447 = vmatprep.subr.bf16.mxu1 %v2732_v29  ;;  %v2812_v29 = vld [vmem:[#allocation2 + $0x2a8] ss:$16 sps:$4 sm:$0xff]   ;;  %v2817_v30 = vld [vmem:[#allocation2 + $0x4cc] ss:$16 sps:$4 sm:$0xff]  }
  0x72   :  { %1370 = vmatpush1.bf16.msra.mxu0 %v2733_v32  ;;  %v2815_v32 = vld [vmem:[#allocation2 + $0x4c8] ss:$16 sps:$4 sm:$0xff]  }
  0x73   :  { %1448 = vmatpush1.bf16.msra.mxu1 %v2730_v31  ;;  %1371 = vmatprep.subr.bf16.mxu0 %v2741_v34  ;;  %v2820_v31 = vld [vmem:[#allocation2 + $0x28c] ss:$16 sps:$4 sm:$0xff]  }
  0x74   :  { %1449 = vmatprep.subr.bf16.mxu1 %v2738_v33  ;;  %v2818_v33 = vld [vmem:[#allocation2 + $0x288] ss:$16 sps:$4 sm:$0xff]   ;;  %v2823_v34 = vld [vmem:[#allocation2 + $0x4ac] ss:$16 sps:$4 sm:$0xff]  }
  0x76   :  { %1372 = vmatpush1.bf16.msra.mxu0 %v2739_v38  ;;  %v2832_v38 = vld [vmem:[#allocation2 + $0x24c] ss:$16 sps:$4 sm:$0xff]  }
  0x77   :  { %1450 = vmatpush1.bf16.msra.mxu1 %v2736_v37  ;;  %1373 = vmatprep.subr.bf16.mxu0 %v2747_v41  ;;  %v2829_v37 = vld [vmem:[#allocation2 + $0x48c] ss:$16 sps:$4 sm:$0xff]  }
  0x78   :  { %1451 = vmatprep.subr.bf16.mxu1 %v2744_v39  ;;  %v2827_v39 = vld [vmem:[#allocation2 + $0x488] ss:$16 sps:$4 sm:$0xff]   ;;  %v2835_v41 = vld [vmem:[#allocation2 + $0x46c] ss:$16 sps:$4 sm:$0xff]  }
  0x7a   :  { %1374 = vmatpush1.bf16.msra.mxu0 %v2745_v43  ;;  %v2833_v43 = vld [vmem:[#allocation2 + $0x468] ss:$16 sps:$4 sm:$0xff]  }
  0x7b   :  { %1452 = vmatpush1.bf16.msra.mxu1 %v2742_v42  ;;  %1375 = vmatprep.subr.bf16.mxu0 %v2753_v45  ;;  %v2838_v42 = vld [vmem:[#allocation2 + $0x22c] ss:$16 sps:$4 sm:$0xff]  }
  0x7c   :  { %1453 = vmatprep.subr.bf16.mxu1 %v2750_v44  ;;  %v2841_v44 = vld [vmem:[#allocation2 + $0x44c] ss:$16 sps:$4 sm:$0xff]  }
  0x7d   :  { %v2844_v45 = vld [vmem:[#allocation2 + $0x20c] ss:$16 sps:$4 sm:$0xff]  }
  0x7e   :  { %1376 = vmatpush2.bf16.msra.mxu0 %v2751_v47  ;;  %v2842_v47 = vld [vmem:[#allocation2 + $0x208] ss:$16 sps:$4 sm:$0xff]  }
  0x7f   :  { %1454 = vmatpush1.bf16.msra.mxu1 %v2748_v46  ;;  %1377 = vmatprep.subr.bf16.mxu0 %v2759_v49  ;;  %v2839_v46 = vld [vmem:[#allocation2 + $0x448] ss:$16 sps:$4 sm:$0xff]   ;;  %v2850_v49 = vld [vmem:[#allocation2 + $0x3ec] ss:$16 sps:$4 sm:$0xff]  }
  0x80   :  { %1455 = vmatprep.subr.bf16.mxu1 %v2756_v48  ;;  %v2847_v48 = vld [vmem:[#allocation2 + $0x42c] ss:$16 sps:$4 sm:$0xff]  }
  0x82   :  { %1378 = vmatpush2.bf16.msra.mxu0 %v2757_v51  ;;  %v2848_v51 = vld [vmem:[#allocation2 + $0x3e8] ss:$16 sps:$4 sm:$0xff]  }
  0x83   :  { %1456 = vmatpush1.bf16.msra.mxu1 %v2754_v50  ;;  %1379 = vmatprep.subr.bf16.mxu0 %v2765_v53  ;;  %v2845_v50 = vld [vmem:[#allocation2 + $0x428] ss:$16 sps:$4 sm:$0xff]   ;;  %v2856_v53 = vld [vmem:[#allocation2 + $0x3cc] ss:$16 sps:$4 sm:$0xff]  }
  0x84   :  { %1457 = vmatprep.subr.bf16.mxu1 %v2762_v52  ;;  %v2853_v52 = vld [vmem:[#allocation2 + $0x40c] ss:$16 sps:$4 sm:$0xff]  }
  0x86   :  { %1380 = vmatpush2.bf16.msra.mxu0 %v2763_v56  ;;  %v2854_v56 = vld [vmem:[#allocation2 + $0x3c8] ss:$16 sps:$4 sm:$0xff]  }
  0x87   :  { %1458 = vmatpush2.bf16.msra.mxu1 %v2760_v54  ;;  %1381 = vmatprep.subr.bf16.mxu0 %v2771_v58  ;;  %v2851_v54 = vld [vmem:[#allocation2 + $0x408] ss:$16 sps:$4 sm:$0xff]   ;;  %v2862_v58 = vld [vmem:[#allocation2 + $0x3ac] ss:$16 sps:$4 sm:$0xff]  }
  0x88   :  { %1459 = vmatprep.subr.bf16.mxu1 %v2768_v57  ;;  %v2859_v57 = vld [vmem:[#allocation2 + $0x5ec] ss:$16 sps:$4 sm:$0xff]  }
  0x8a   :  { %1382 = vmatpush2.bf16.msra.mxu0 %v2769_v60  ;;  %v2860_v60 = vld [vmem:[#allocation2 + $0x3a8] ss:$16 sps:$4 sm:$0xff]  }
  0x8b   :  { %1460 = vmatpush2.bf16.msra.mxu1 %v2766_v59  ;;  %1383 = vmatprep.subr.bf16.mxu0 %v2777_v62  ;;  %v2857_v59 = vld [vmem:[#allocation2 + $0x5e8] ss:$16 sps:$4 sm:$0xff]   ;;  %v2868_v62 = vld [vmem:[#allocation2 + $0x38c] ss:$16 sps:$4 sm:$0xff]  }
  0x8c   :  { %1461 = vmatprep.subr.bf16.mxu1 %v2774_v61  ;;  %v2865_v61 = vld [vmem:[#allocation2 + $0x5cc] ss:$16 sps:$4 sm:$0xff]  }
  0x8e   :  { %1384 = vmatpush2.bf16.msra.mxu0 %v2775_v0  ;;  %v2866_v0 = vld [vmem:[#allocation2 + $0x388] ss:$16 sps:$4 sm:$0xff]  }
  0x8f   :  { %1462 = vmatpush2.bf16.msra.mxu1 %v2772_v63  ;;  %1385 = vmatprep.subr.bf16.mxu0 %v2783_v2  ;;  %v2863_v63 = vld [vmem:[#allocation2 + $0x5c8] ss:$16 sps:$4 sm:$0xff]   ;;  %v2874_v2 = vld [vmem:[#allocation2 + $0x36c] ss:$16 sps:$4 sm:$0xff]  }
  0x90   :  { %1463 = vmatprep.subr.bf16.mxu1 %v2780_v1  ;;  %v2871_v1 = vld [vmem:[#allocation2 + $0x5ac] ss:$16 sps:$4 sm:$0xff]  }
  0x92   :  { %1386 = vmatpush2.bf16.msra.mxu0 %v2781_v4  ;;  %v2872_v4 = vld [vmem:[#allocation2 + $0x368] ss:$16 sps:$4 sm:$0xff]  }
  0x93   :  { %1464 = vmatpush2.bf16.msra.mxu1 %v2778_v3  ;;  %1387 = vmatprep.subr.bf16.mxu0 %v2789_v6  ;;  %v2869_v3 = vld [vmem:[#allocation2 + $0x5a8] ss:$16 sps:$4 sm:$0xff]   ;;  %v2880_v6 = vld [vmem:[#allocation2 + $0x34c] ss:$16 sps:$4 sm:$0xff]  }
  0x94   :  { %1465 = vmatprep.subr.bf16.mxu1 %v2786_v5  ;;  %v2877_v5 = vld [vmem:[#allocation2 + $0x58c] ss:$16 sps:$4 sm:$0xff]  }
  0x96   :  { %1388 = vmatpush2.bf16.msra.mxu0 %v2787_v10  ;;  %v2878_v10 = vld [vmem:[#allocation2 + $0x348] ss:$16 sps:$4 sm:$0xff]  }
  0x97   :  { %1466 = vmatpush2.bf16.msra.mxu1 %v2784_v7  ;;  %1389 = vmatprep.subr.bf16.mxu0 %v2795_v12  ;;  %v2875_v7 = vld [vmem:[#allocation2 + $0x588] ss:$16 sps:$4 sm:$0xff]   ;;  %v2886_v12 = vld [vmem:[#allocation2 + $0x32c] ss:$16 sps:$4 sm:$0xff]  }
  0x98   :  { %1467 = vmatprep.subr.bf16.mxu1 %v2792_v11  ;;  %v2883_v11 = vld [vmem:[#allocation2 + $0x56c] ss:$16 sps:$4 sm:$0xff]  }
  0x9a   :  { %1390 = vmatpush2.bf16.msra.mxu0 %v2793_v14  ;;  %v2884_v14 = vld [vmem:[#allocation2 + $0x328] ss:$16 sps:$4 sm:$0xff]  }
  0x9b   :  { %1468 = vmatpush2.bf16.msra.mxu1 %v2790_v13  ;;  %1482 = vmatprep.subr.bf16.mxu0 %v2802_v17  ;;  %v2881_v13 = vld [vmem:[#allocation2 + $0x568] ss:$16 sps:$4 sm:$0xff]   ;;  %v2892_v17 = vld [vmem:[#allocation2 + $0x30c] ss:$16 sps:$4 sm:$0xff]  }
  0x9c   :  { %1469 = vmatprep.subr.bf16.mxu1 %v2799_v15  ;;  %v2889_v15 = vld [vmem:[#allocation2 + $0x54c] ss:$16 sps:$4 sm:$0xff]  }
  0x9d   :  { %1392 = vmatmul.mubr.bf16.vlgmr.msra.gmra.mxu0 %v3154_v18 }
  0x9e   :  { %1483 = vmatpush1.bf16.msra.mxu0 %v2800_v21  ;;  %1514 = vmatprep.mubr.bf16.mxu0 %v3123_v55  ;;  %v2824_v55 = vld [vmem:[#allocation2 + $0x268] ss:$16 sps:$4 sm:$0xff]  }
  0x9f   :  { %1470 = vmatpush2.bf16.msra.mxu1 %v2797_v20  ;;  %1484 = vmatprep.subr.bf16.mxu0 %v2808_v23  ;;  %v2887_v20 = vld [vmem:[#allocation2 + $0x548] ss:$16 sps:$4 sm:$0xff]   ;;  %v2904_v23 = vld [vmem:[#allocation4 + $0x74] ss:$8 sps:$4 sm:$0xff]  }
  0xa0   :  { %1471 = vmatprep.subr.bf16.mxu1 %v2805_v22  ;;  %v2890_v21 = vld [vmem:[#allocation2 + $0x308] ss:$16 sps:$4 sm:$0xff]   ;;  %v2895_v22 = vld [vmem:[#allocation2 + $0x52c] ss:$16 sps:$4 sm:$0xff]  }
  0xa2   :  { %1485 = vmatpush1.bf16.msra.mxu0 %v2806_v25  ;;  %v2902_v25 = vld [vmem:[#allocation4 + $0x70] ss:$8 sps:$4 sm:$0xff]  }
  0xa3   :  { %1472 = vmatpush2.bf16.msra.mxu1 %v2803_v24  ;;  %1486 = vmatprep.subr.bf16.mxu0 %v2814_v27  ;;  %v2893_v24 = vld [vmem:[#allocation2 + $0x528] ss:$16 sps:$4 sm:$0xff]   ;;  %v2907_v27 = vld [vmem:[#allocation4 + $0x64] ss:$8 sps:$4 sm:$0xff]  }
  0xa4   :  { %1523 = vmatprep.subr.bf16.mxu1 %v2811_v26  ;;  %v2898_v26 = vld [vmem:[#allocation2 + $0x50c] ss:$16 sps:$4 sm:$0xff]  }
  0xa6   :  { %1474 = vmatmul.mubr.bf16.vlgmr.msra.gmra.mxu1 %v3127_v8  ;;  %1487 = vmatpush1.bf16.msra.mxu0 %v2812_v29  ;;  %v2830_v8 = vld [vmem:[#allocation2 + $0x248] ss:$16 sps:$4 sm:$0xff]  }
  0xa7   :  { %1524 = vmatpush1.bf16.msra.mxu1 %v2809_v28  ;;  %1488 = vmatprep.subr.bf16.mxu0 %v2820_v31  ;;  %v2896_v28 = vld [vmem:[#allocation2 + $0x508] ss:$16 sps:$4 sm:$0xff]   ;;  %v2910_v31 = vld [vmem:[#allocation4 + $0x54] ss:$8 sps:$4 sm:$0xff]  }
  0xa8   :  { %1525 = vmatprep.subr.bf16.mxu1 %v2817_v30  ;;  %1555 = vmatprep.mubr.bf16.mxu1 %v3149_v40  ;;  %v2836_v40 = vld [vmem:[#allocation2 + $0x228] ss:$16 sps:$4 sm:$0xff]   ;;  %v2901_v30 = vld [vmem:[#allocation2 + $0x60c] ss:$16 sps:$4 sm:$0xff]  }
  0xa9   :  { %v2905_v29 = vld [vmem:[#allocation4 + $0x60] ss:$8 sps:$4 sm:$0xff]  }
  0xaa   :  { %1489 = vmatpush1.bf16.msra.mxu0 %v2818_v33  ;;  %v2908_v33 = vld [vmem:[#allocation4 + $0x50] ss:$8 sps:$4 sm:$0xff]  }
  0xab   :  { %1526 = vmatpush1.bf16.msra.mxu1 %v2815_v32  ;;  %1490 = vmatprep.subr.bf16.mxu0 %v2826_v35  ;;  %v2899_v32 = vld [vmem:[#allocation2 + $0x608] ss:$16 sps:$4 sm:$0xff]   ;;  %v2916_v35 = vld [vmem:[#allocation4 + $0x34] ss:$8 sps:$4 sm:$0xff]  }
  0xac   :  { %1527 = vmatprep.subr.bf16.mxu1 %v2823_v34  ;;  %v2913_v34 = vld [vmem:[#allocation4 + $0x44] ss:$8 sps:$4 sm:$0xff]  }
  0xae   :  { %1491 = vmatpush1.bf16.msra.mxu0 %v2824_v55  ;;  %v2950_v55 = vld [vmem:[#allocation4 + $0x170] ss:$8 sps:$4 sm:$0xff]  }
  0xaf   :  { %1528 = vmatpush1.bf16.msra.mxu1 %v2821_v36  ;;  %1492 = vmatprep.subr.bf16.mxu0 %v2832_v38  ;;  %v2914_v36 = vld [vmem:[#allocation4 + $0x30] ss:$8 sps:$4 sm:$0xff]   ;;  %v2919_v38 = vld [vmem:[#allocation4 + $0x24] ss:$8 sps:$4 sm:$0xff]  }
  0xb0   :  { %1529 = vmatprep.subr.bf16.mxu1 %v2829_v37  ;;  %v2952_v37 = vld [vmem:[#allocation4 + $0x174] ss:$8 sps:$4 sm:$0xff]  }
  0xb2   :  { %1493 = vmatpush1.bf16.msra.mxu0 %v2830_v8  ;;  %v2917_v8 = vld [vmem:[#allocation4 + $0x20] ss:$8 sps:$4 sm:$0xff]  }
  0xb3   :  { %1530 = vmatpush1.bf16.msra.mxu1 %v2827_v39  ;;  %1494 = vmatprep.subr.bf16.mxu0 %v2838_v42  ;;  %v2955_v39 = vld [vmem:[#allocation4 + $0x164] ss:$8 sps:$4 sm:$0xff]   ;;  %v2956_v42 = vld [vmem:[#allocation4 + $0x150] ss:$8 sps:$4 sm:$0xff]  }
  0xb4   :  { %1531 = vmatprep.subr.bf16.mxu1 %v2835_v41  ;;  %v2922_v41 = vld [vmem:[#allocation4 + $0x14] ss:$8 sps:$4 sm:$0xff]  }
  0xb6   :  { %1495 = vmatpush1.bf16.msra.mxu0 %v2836_v40  ;;  %v2961_v40 = vld [vmem:[#allocation4 + $0x144] ss:$8 sps:$4 sm:$0xff]  }
  0xb7   :  { %1532 = vmatpush1.bf16.msra.mxu1 %v2833_v43  ;;  %1496 = vmatprep.subr.bf16.mxu0 %v2844_v45  ;;  %v2920_v43 = vld [vmem:[#allocation4 + $0x10] ss:$8 sps:$4 sm:$0xff]   ;;  %v2959_v45 = vld [vmem:[#allocation4 + $0x140] ss:$8 sps:$4 sm:$0xff]  }
  0xb8   :  { %1533 = vmatprep.subr.bf16.mxu1 %v2841_v44  ;;  %v2925_v44 = vld [vmem:[#allocation4 + $0x4] ss:$8 sps:$4 sm:$0xff]  }
  0xba   :  { %1497 = vmatpush1.bf16.msra.mxu0 %v2842_v47  ;;  %v2928_v47 = vld [vmem:[#allocation4 + $0xf4] ss:$8 sps:$4 sm:$0xff]  }
  0xbb   :  { %1534 = vmatpush1.bf16.msra.mxu1 %v2839_v46  ;;  %1498 = vmatprep.subr.bf16.mxu0 %v2850_v49  ;;  %v2964_v46 = vld [vmem:[#allocation4 + $0x134] ss:$8 sps:$4 sm:$0xff]   ;;  %v2926_v49 = vld [vmem:[#allocation4 + $0xf0] ss:$8 sps:$4 sm:$0xff]  }
  0xbc   :  { %1535 = vmatprep.subr.bf16.mxu1 %v2847_v48  ;;  %v2962_v48 = vld [vmem:[#allocation4 + $0x130] ss:$8 sps:$4 sm:$0xff]  }
  0xbe   :  { %1499 = vmatpush2.bf16.msra.mxu0 %v2848_v51  ;;  %v2931_v51 = vld [vmem:[#allocation4 + $0xe4] ss:$8 sps:$4 sm:$0xff]  }
  0xbf   :  { %1536 = vmatpush1.bf16.msra.mxu1 %v2845_v50  ;;  %1500 = vmatprep.subr.bf16.mxu0 %v2856_v53  ;;  %v2967_v50 = vld [vmem:[#allocation4 + $0x124] ss:$8 sps:$4 sm:$0xff]   ;;  %v2929_v53 = vld [vmem:[#allocation4 + $0xe0] ss:$8 sps:$4 sm:$0xff]  }
  0xc0   :  { %1537 = vmatprep.subr.bf16.mxu1 %v2853_v52  ;;  %v2965_v52 = vld [vmem:[#allocation4 + $0x120] ss:$8 sps:$4 sm:$0xff]  }
  0xc2   :  { %1501 = vmatpush2.bf16.msra.mxu0 %v2854_v56  ;;  %v2934_v56 = vld [vmem:[#allocation4 + $0xd4] ss:$8 sps:$4 sm:$0xff]  }
  0xc3   :  { %1538 = vmatpush1.bf16.msra.mxu1 %v2851_v54  ;;  %1502 = vmatprep.subr.bf16.mxu0 %v2862_v58  ;;  %v2970_v54 = vld [vmem:[#allocation4 + $0x114] ss:$8 sps:$4 sm:$0xff]   ;;  %v2932_v58 = vld [vmem:[#allocation4 + $0xd0] ss:$8 sps:$4 sm:$0xff]  }
  0xc4   :  { %1539 = vmatprep.subr.bf16.mxu1 %v2859_v57  ;;  %v2968_v57 = vld [vmem:[#allocation4 + $0x110] ss:$8 sps:$4 sm:$0xff]  }
  0xc6   :  { %1503 = vmatpush2.bf16.msra.mxu0 %v2860_v60  ;;  %v2937_v60 = vld [vmem:[#allocation4 + $0xc4] ss:$8 sps:$4 sm:$0xff]  }
  0xc7   :  { %1540 = vmatpush2.bf16.msra.mxu1 %v2857_v59  ;;  %1504 = vmatprep.subr.bf16.mxu0 %v2868_v62  ;;  %v2973_v59 = vld [vmem:[#allocation4 + $0x104] ss:$8 sps:$4 sm:$0xff]   ;;  %v2935_v62 = vld [vmem:[#allocation4 + $0xc0] ss:$8 sps:$4 sm:$0xff]  }
  0xc8   :  { %1541 = vmatprep.subr.bf16.mxu1 %v2865_v61  ;;  %v2971_v61 = vld [vmem:[#allocation4 + $0x100] ss:$8 sps:$4 sm:$0xff]  }
  0xca   :  { %1505 = vmatpush2.bf16.msra.mxu0 %v2866_v0  ;;  %v2940_v0 = vld [vmem:[#allocation4 + $0xb4] ss:$8 sps:$4 sm:$0xff]  }
  0xcb   :  { %1542 = vmatpush2.bf16.msra.mxu1 %v2863_v63  ;;  %1506 = vmatprep.subr.bf16.mxu0 %v2874_v2  ;;  %v2976_v63 = vld [vmem:[#allocation4 + $0x1f4] ss:$8 sps:$4 sm:$0xff]   ;;  %v2938_v2 = vld [vmem:[#allocation4 + $0xb0] ss:$8 sps:$4 sm:$0xff]  }
  0xcc   :  { %1543 = vmatprep.subr.bf16.mxu1 %v2871_v1  ;;  %v2974_v1 = vld [vmem:[#allocation4 + $0x1f0] ss:$8 sps:$4 sm:$0xff]  }
  0xce   :  { %1507 = vmatpush2.bf16.msra.mxu0 %v2872_v4  ;;  %v2943_v4 = vld [vmem:[#allocation4 + $0xa4] ss:$8 sps:$4 sm:$0xff]  }
  0xcf   :  { %1544 = vmatpush2.bf16.msra.mxu1 %v2869_v3  ;;  %1508 = vmatprep.subr.bf16.mxu0 %v2880_v6  ;;  %v2979_v3 = vld [vmem:[#allocation4 + $0x1e4] ss:$8 sps:$4 sm:$0xff]   ;;  %v2941_v6 = vld [vmem:[#allocation4 + $0xa0] ss:$8 sps:$4 sm:$0xff]  }
  0xd0   :  { %1545 = vmatprep.subr.bf16.mxu1 %v2877_v5  ;;  %v2977_v5 = vld [vmem:[#allocation4 + $0x1e0] ss:$8 sps:$4 sm:$0xff]  }
  0xd2   :  { %1509 = vmatpush2.bf16.msra.mxu0 %v2878_v10  ;;  %v2944_v10 = vld [vmem:[#allocation4 + $0x90] ss:$8 sps:$4 sm:$0xff]  }
  0xd3   :  { %1546 = vmatpush2.bf16.msra.mxu1 %v2875_v7  ;;  %1510 = vmatprep.subr.bf16.mxu0 %v2886_v12  ;;  %v2946_v7 = vld [vmem:[#allocation4 + $0x94] ss:$8 sps:$4 sm:$0xff]   ;;  %v2947_v12 = vld [vmem:[#allocation4 + $0x80] ss:$8 sps:$4 sm:$0xff]  }
  0xd4   :  { %1547 = vmatprep.subr.bf16.mxu1 %v2883_v11  ;;  %v2949_v11 = vld [vmem:[#allocation4 + $0x84] ss:$8 sps:$4 sm:$0xff]  }
  0xd6   :  { %1511 = vmatpush2.bf16.msra.mxu0 %v2884_v14 }
  0xd7   :  { %1548 = vmatpush2.bf16.msra.mxu1 %v2881_v13  ;;  %1512 = vmatprep.subr.bf16.mxu0 %v2892_v17 }
  0xd8   :  { %1549 = vmatprep.subr.bf16.mxu1 %v2889_v15  ;;  %v2982_v15 = vld [vmem:[#allocation4 + $0x1d4] ss:$8 sps:$4 sm:$0xff]  }
  0xda   :  { %1513 = vmatpush2.bf16.msra.mxu0 %v2890_v21  ;;  %v2980_v21 = vld [vmem:[#allocation4 + $0x1d0] ss:$8 sps:$4 sm:$0xff]  }
  0xdb   :  { %1550 = vmatpush2.bf16.msra.mxu1 %v2887_v20  ;;  %2017 = vmatprep.subr.bf16.mxu0 %v2904_v23 }
  0xdc   :  { %1551 = vmatprep.subr.bf16.mxu1 %v2895_v22  ;;  %v2985_v22 = vld [vmem:[#allocation4 + $0x1c4] ss:$8 sps:$4 sm:$0xff]  }
  0xdd   :  { %1515 = vmatmul.mubr.bf16.vlgmr.msra.gmra.mxu0 %v3129_v9  ;;  %v2911_v9 = vld [vmem:[#allocation4 + $0x40] ss:$8 sps:$4 sm:$0xff]  }
  0xde   :  { %2018 = vmatpush1.bf16.msra.mxu0 %v2902_v25  ;;  %v2983_v25 = vld [vmem:[#allocation4 + $0x1c0] ss:$8 sps:$4 sm:$0xff]  }
  0xdf   :  { %1552 = vmatpush2.bf16.msra.mxu1 %v2893_v24  ;;  %2019 = vmatprep.subr.bf16.mxu0 %v2907_v27 }
  0xe0   :  { %1553 = vmatprep.subr.bf16.mxu1 %v2898_v26 }
  0xe2   :  { %2020 = vmatpush1.bf16.msra.mxu0 %v2905_v29  ;;  %v2988_v29 = vld [vmem:[#allocation4 + $0x1b4] ss:$8 sps:$4 sm:$0xff]  }
  0xe3   :  { %1554 = vmatpush2.bf16.msra.mxu1 %v2896_v28  ;;  %2021 = vmatprep.subr.bf16.mxu0 %v2910_v31  ;;  %v2986_v31 = vld [vmem:[#allocation4 + $0x1b0] ss:$8 sps:$4 sm:$0xff]  }
  0xe4   :  { %1578 = vmatprep.subr.bf16.mxu1 %v2901_v30 }
  0xe6   :  { %1556 = vmatmul.mubr.bf16.vlgmr.msra.gmra.mxu1 %v3154_v18  ;;  %2022 = vmatpush1.bf16.msra.mxu0 %v2908_v33  ;;  %v2953_v18 = vld [vmem:[#allocation4 + $0x160] ss:$8 sps:$4 sm:$0xff]   ;;  %v2991_v33 = vld [vmem:[#allocation4 + $0x1a4] ss:$8 sps:$4 sm:$0xff]  }
  0xe7   :  { %1579 = vmatpush1.bf16.msra.mxu1 %v2899_v32  ;;  %1596 = vmatprep.mubr.bf16.mxu1 %v3068_v16  ;;  %v2958_v16 = vld [vmem:[#allocation4 + $0x154] ss:$8 sps:$4 sm:$0xff]  }
  0xe8   :  { %2023 = vmatprep.subr.bf16.mxu0 %v2913_v34  ;;  %2058 = vmatprep.subr.bf16.mxu1 %v2952_v37  ;;  %v2995_v37 = vld [vmem:[#allocation4 + $0x180] ss:$8 sps:$4 sm:$0xff]  }
  0xea   :  { %2024 = vmatpush1.bf16.msra.mxu0 %v2911_v9  ;;  %v2989_v9 = vld [vmem:[#allocation4 + $0x1a0] ss:$8 sps:$4 sm:$0xff]  }
  0xeb   :  { %2025 = vmatprep.subr.bf16.mxu0 %v2916_v35  ;;  %v2994_v35 = vld [vmem:[#allocation4 + $0x194] ss:$8 sps:$4 sm:$0xff]  }
  0xee   :  { %2493 = vmatmul.mubr.msk.bf16.vlgmr.msra.gmra.mxu1 %vm1273_vm0, %v3137_v19  ;;  %2026 = vmatpush1.bf16.msra.mxu0 %v2914_v36  ;;  %v2923_v19 = vld [vmem:[#allocation4] ss:$8 sps:$4 sm:$0xff]   ;;  %v2992_v36 = vld [vmem:[#allocation4 + $0x190] ss:$8 sps:$4 sm:$0xff]  }
  0xef   :  { %2059 = vmatpush1.bf16.msra.mxu1 %v2950_v55  ;;  %2027 = vmatprep.subr.bf16.mxu0 %v2919_v38  ;;  %v2997_v55 = vld [vmem:[#allocation4 + $0x184] ss:$8 sps:$4 sm:$0xff]   ;;  %v273_v38 = vlaneseq }
  0xf0   :  { %2060 = vmatprep.subr.bf16.mxu1 %v2955_v39 }
  0xf1   :  { %v3165_v39 = vshrl.u32 %v273_v38, 7  ;;  %v3003_v38 = vld [vmem:[%s3244_s5 + $0x28] sm:$0xff]  }
  0xf2   :  { %2028 = vmatpush1.bf16.msra.mxu0 %v2917_v8  ;;  %v271_v8 = vld [vmem:[%s3241_s2] sm:$0xf] }
  0xf3   :  { %2061 = vmatpush1.bf16.msra.mxu1 %v2953_v18  ;;  %2029 = vmatprep.subr.bf16.mxu0 %v2922_v41  ;;  %v275_v18 = vsub.s32 0, %v3165_v39 }
  0xf4   :  { %2062 = vmatprep.subr.bf16.mxu1 %v2958_v16  ;;  %v279_v16 = vsub.s32 1, %v3165_v39 }
  0xf5   :  { %v276_v41 = vrot.slane %v271_v8, %v275_v18 }
  0xf6   :  { %2030 = vmatpush1.bf16.msra.mxu0 %v2920_v43 }
  0xf7   :  { %2063 = vmatpush1.bf16.msra.mxu1 %v2956_v42  ;;  %2031 = vmatprep.subr.bf16.mxu0 %v2925_v44  ;;  %v280_v42 = vrot.slane %v271_v8, %v279_v16 }
  0xf8   :  { %2064 = vmatprep.subr.bf16.mxu1 %v2961_v40 }
  0xfa   :  { %2032 = vmatpush1.bf16.msra.mxu0 %v2923_v19 }
  0xfb   :  { %2065 = vmatpush1.bf16.msra.mxu1 %v2959_v45  ;;  %2033 = vmatprep.subr.bf16.mxu0 %v2928_v47 }
  0xfc   :  { %2066 = vmatprep.subr.bf16.mxu1 %v2964_v46 }
  0xfe   :  { %2034 = vmatpush2.bf16.msra.mxu0 %v2926_v49 }
  0xff   :  { %2067 = vmatpush1.bf16.msra.mxu1 %v2962_v48  ;;  %2035 = vmatprep.subr.bf16.mxu0 %v2931_v51 }
 0x100   :  { %2068 = vmatprep.subr.bf16.mxu1 %v2967_v50 }
 0x102   :  { %2036 = vmatpush2.bf16.msra.mxu0 %v2929_v53 }
 0x103   :  { %2069 = vmatpush1.bf16.msra.mxu1 %v2965_v52  ;;  %2037 = vmatprep.subr.bf16.mxu0 %v2934_v56 }
 0x104   :  { %2070 = vmatprep.subr.bf16.mxu1 %v2970_v54 }
 0x106   :  { %2038 = vmatpush2.bf16.msra.mxu0 %v2932_v58 }
 0x107   :  { %2071 = vmatpush1.bf16.msra.mxu1 %v2968_v57  ;;  %2039 = vmatprep.subr.bf16.mxu0 %v2937_v60 }
 0x108   :  { %2072 = vmatprep.subr.bf16.mxu1 %v2973_v59 }
 0x10a   :  { %2040 = vmatpush2.bf16.msra.mxu0 %v2935_v62 }
 0x10b   :  { %2073 = vmatpush1.bf16.msra.mxu1 %v2971_v61  ;;  %2041 = vmatprep.subr.bf16.mxu0 %v2940_v0 }
 0x10c   :  { %2074 = vmatprep.subr.bf16.mxu1 %v2976_v63 }
 0x10e   :  { %2042 = vmatpush2.bf16.msra.mxu0 %v2938_v2  ;;  %v283_v2 = vsub.s32 2, %v3165_v39 }
 0x10f   :  { %2075 = vmatpush2.bf16.msra.mxu1 %v2974_v1  ;;  %2043 = vmatprep.subr.bf16.mxu0 %v2943_v4  ;;  %v287_v4 = vsub.s32 3, %v3165_v39 }
 0x110   :  { %2076 = vmatprep.subr.bf16.mxu1 %v2979_v3 }
 0x112   :  { %2044 = vmatpush2.bf16.msra.mxu0 %v2941_v6  ;;  %v284_v6 = vrot.slane %v271_v8, %v283_v2 }
 0x113   :  { %2077 = vmatpush2.bf16.msra.mxu1 %v2977_v5  ;;  %2045 = vmatprep.subr.bf16.mxu0 %v2946_v7 }
 0x114   :  { %2078 = vmatprep.subr.bf16.mxu1 %v2982_v15 }
 0x116   :  { %2046 = vmatpush2.bf16.msra.mxu0 %v2944_v10  ;;  %v288_v10 = vrot.slane %v271_v8, %v287_v4  ;;  %v3004_v8 = vld [vmem:[%s3244_s5 + $0x60] sm:$0xff]  }
 0x117   :  { %2047 = vmatprep.subr.bf16.mxu0 %v2949_v11  ;;  %2079 = vmatpush2.bf16.msra.mxu1 %v2980_v21 }
 0x118   :  { %2080 = vmatprep.subr.bf16.mxu1 %v2985_v22 }
 0x11a   :  { %2048 = vmatpush2.bf16.msra.mxu0 %v2947_v12 }
 0x11b   :  { %2081 = vmatpush2.bf16.msra.mxu1 %v2983_v25 }
 0x11c   :  { %2082 = vmatprep.subr.bf16.mxu1 %v2988_v29  ;;  %v2999_v29 = vld [vmem:[%s3244_s5 + $0x38] sm:$0xff]  }
 0x11d   :  { %v1311_v13 = vpop.f32.mrf.mxu0 }
 0x11e   :  { %v1352_v14 = vpop.f32.mrf.mxu1  ;;  %v1312_v43 = vadd.f32 %v1311_v13, %v276_v41  ;;  %v3005_v41 = vld [vmem:[%s3244_s5 + $0x20] sm:$0xff]  }
 0x11f   :  { %v1313_v17 = vpop.f32.mrf.mxu0  ;;  %2083 = vmatpush2.bf16.msra.mxu1 %v2986_v31 }
 0x120   :  { %v1354_v20 = vpop.f32.mrf.mxu1  ;;  %2084 = vmatprep.subr.bf16.mxu1 %v2991_v33  ;;  %v1314_v40 = vadd.f32 %v1313_v17, %v280_v42  ;;  %v1353_v44 = vadd.f32 %v1352_v14, %v1312_v43  ;;  %v3006_v42 = vld [vmem:[%s3244_s5 + $0x58] sm:$0xff]  }
 0x121   :  { %v1315_v24 = vpop.f32.mrf.mxu0  ;;  %v3007_v43 = vld [vmem:[%s3244_s5 + $0x18] sm:$0xff]  }
 0x122   :  { %v1356_v23 = vpop.f32.mrf.mxu1  ;;  %v1355_v19 = vadd.f32 %v1354_v20, %v1314_v40  ;;  %v3008_v40 = vld [vmem:[%s3244_s5 + $0x50] sm:$0xff]  }
 0x123   :  { %v1316_v27 = vpop.f32.mrf.mxu0  ;;  %2085 = vmatpush2.bf16.msra.mxu1 %v2989_v9  ;;  %v3001_v9 = vld [vmem:[%s3244_s5 + $0x30] sm:$0xff]  }
 0x124   :  { %v1357_v26 = vpop.f32.mrf.mxu1  ;;  %2086 = vmatprep.subr.bf16.mxu1 %v2994_v35 }
 0x126   :  { %v1434_v28 = vpop.f32.mrf.mxu1 }
 0x127   :  { %2087 = vmatpush2.bf16.msra.mxu1 %v2992_v36  ;;  %v3002_v36 = vld [vmem:[%s3244_s5 + $0x68] sm:$0xff]  }
 0x128   :  { %v1436_v30 = vpop.f32.mrf.mxu1  ;;  %2088 = vmatprep.subr.bf16.mxu1 %v2997_v55 }
 0x12a   :  { %v1438_v32 = vpop.f32.mrf.mxu1 }
 0x12b   :  { %2089 = vmatpush2.bf16.msra.mxu1 %v2995_v37 }
 0x12c   :  { %v1439_v34 = vpop.f32.mrf.mxu1 }
 0x15d   :  { %v1393_v45 = vpop.f32.mrf.mxu0 }
 0x15e   :  { %v1394_v46 = vadd.f32 %v1393_v45, %v1353_v44  ;;  %v3009_v44 = vld [vmem:[%s3244_s5 + $0x10] sm:$0xff]   ;;  %v3010_v45 = vld [vmem:[%s3244_s5 + $0x48] sm:$0xff]  }
 0x15f   :  { %v1395_v47 = vpop.f32.mrf.mxu0 }
 0x160   :  { %v1435_v48 = vadd.f32 %v1434_v28, %v1394_v46  ;;  %v1396_v49 = vadd.f32 %v1395_v47, %v1355_v19  ;;  %v2998_v28 = vld [vmem:[%s3244_s5 + $0x78] sm:$0xff]   ;;  %v3011_v19 = vld [vmem:[%s3244_s5 + $0x8] sm:$0xff]   ;;  %v3012_v46 = vld [vmem:[%s3244_s5 + $0x40] sm:$0xff]  }
 0x161   :  { %v1397_v50 = vpop.f32.mrf.mxu0  ;;  %2576 = vmatprep.subr.bf16.mxu0 %v2998_v28  ;;  %v3013_v47 = vld [vmem:[%s3244_s5] sm:$0xff]  }
 0x162   :  { %vm1605_vm1 = vcmp.gt.f32.partialorder %v1435_v48, 0.0  ;;  %v1609_v51 = vmul.f32 0.2, %v1435_v48  ;;  %v1437_v52 = vadd.f32 %v1436_v30, %v1396_v49  ;;  %v3000_v30 = vld [vmem:[%s3244_s5 + $0x70] sm:$0xff]  }
 0x163   :  { %v1398_v53 = vpop.f32.mrf.mxu0 }
 0x164   :  { %v1610_v54 = vmul.f32 0.2, %v1437_v52  ;;  %vm1606_vm2 = vcmp.gt.f32.partialorder %v1437_v52, 0.0  ;;  %v1613_v56 = vsel %vm1605_vm1, %v1435_v48, %v1609_v51 }
 0x165   :  { %v1617_v61 = vpack.c.bf16 %v1613_v56, %v1613_v56 }
 0x166   :  { %v1475_v57 = vpop.f32.mrf.mxu1  ;;  %v1614_v58 = vsel %vm1606_vm2, %v1437_v52, %v1610_v54  ;;  %v1685_v52 = vld [vmem:[%s3243_s4] sm:$0x3] }
 0x167   :  { %v1618_v60 = vpack.c.bf16 %v1614_v58, %v1614_v58  ;;  %v1476_v12 = vadd.f32 %v1475_v57, %v284_v6  ;;  %v1690_v53 = vrot.slane %v1685_v52, %v275_v18  ;;  %v1694_v54 = vrot.slane %v1685_v52, %v279_v16  ;;  %v2558_v18 = vld [vmem:[%s3245_s6] ss:$0 sm:$0xff] }
 0x168   :  { %v1477_v59 = vpop.f32.mrf.mxu1 }
 0x169   :  { %2049 = vmatprep.mubr.bf16.mxu0 %v1618_v60  ;;  %v1478_v14 = vadd.f32 %v1477_v59, %v288_v10 }
 0x16a   :  { %v1479_v62 = vpop.f32.mrf.mxu1  ;;  %2050 = vmatmul.mubr.bf16.vlgmr.msra.gmra.mxu0 %v1617_v61 }
 0x16b   :  { %2577 = vmatpush3.bf16.msra.mxu0 %v2999_v29 }
 0x16c   :  { %v1480_v63 = vpop.f32.mrf.mxu1  ;;  %2578 = vmatprep.subr.bf16.mxu0 %v3000_v30 }
 0x16f   :  { %2579 = vmatpush3.bf16.msra.mxu0 %v3001_v9 }
 0x170   :  { %2580 = vmatprep.subr.bf16.mxu0 %v3002_v36 }
 0x173   :  { %2581 = vmatpush3.bf16.msra.mxu0 %v3003_v38 }
 0x174   :  { %2582 = vmatprep.subr.bf16.mxu0 %v3004_v8 }
 0x177   :  { %2583 = vmatpush3.bf16.msra.mxu0 %v3005_v41 }
 0x178   :  { %2584 = vmatprep.subr.bf16.mxu0 %v3006_v42 }
 0x17b   :  { %2585 = vmatpush3.bf16.msra.mxu0 %v3007_v43 }
 0x17c   :  { %2586 = vmatprep.subr.bf16.mxu0 %v3008_v40 }
 0x17f   :  { %2587 = vmatpush3.bf16.msra.mxu0 %v3009_v44 }
 0x180   :  { %2588 = vmatprep.subr.bf16.mxu0 %v3010_v45 }
 0x183   :  { %2589 = vmatpush3.bf16.msra.mxu0 %v3011_v19 }
 0x184   :  { %2590 = vmatprep.subr.bf16.mxu0 %v3012_v46 }
 0x187   :  { %2591 = vmatpush3.bf16.msra.mxu0 %v3013_v47 }
 0x19d   :  { %v1516_v0 = vpop.f32.mrf.mxu0 }
 0x19e   :  { %v1517_v15 = vadd.f32 %v1516_v0, %v1476_v12 }
 0x19f   :  { %v1518_v1 = vpop.f32.mrf.mxu0 }
 0x1a0   :  { %v1519_v20 = vadd.f32 %v1518_v1, %v1478_v14 }
 0x1a1   :  { %v1520_v3 = vpop.f32.mrf.mxu0 }
 0x1a3   :  { %v1521_v5 = vpop.f32.mrf.mxu0 }
 0x1a6   :  { %v1557_v7 = vpop.f32.mrf.mxu1 }
 0x1a7   :  { %v1558_v21 = vadd.f32 %v1557_v7, %v1517_v15 }
 0x1a8   :  { %v1559_v11 = vpop.f32.mrf.mxu1 }
 0x1a9   :  { %v1560_v23 = vadd.f32 %v1559_v11, %v1519_v20 }
 0x1aa   :  { %v1561_v13 = vpop.f32.mrf.mxu1 }
 0x1ac   :  { %v1562_v17 = vpop.f32.mrf.mxu1 }
 0x1ae   :  { %v1598_v22 = vpop.f32.mrf.mxu1 }
 0x1af   :  { %v1599_v24 = vadd.f32 %v1598_v22, %v1558_v21 }
 0x1b0   :  { %v1600_v25 = vpop.f32.mrf.mxu1 }
 0x1b1   :  { %vm1607_vm3 = vcmp.gt.f32.partialorder %v1599_v24, 0.0  ;;  %v1611_v26 = vmul.f32 0.2, %v1599_v24  ;;  %v1601_v27 = vadd.f32 %v1600_v25, %v1560_v23 }
 0x1b2   :  { %v1602_v31 = vpop.f32.mrf.mxu1 }
 0x1b3   :  { %vm1608_vm4 = vcmp.gt.f32.partialorder %v1601_v27, 0.0  ;;  %v1612_v32 = vmul.f32 0.2, %v1601_v27  ;;  %v1615_v33 = vsel %vm1607_vm3, %v1599_v24, %v1611_v26 }
 0x1b4   :  { %v1603_v34 = vpop.f32.mrf.mxu1  ;;  %v1619_v37 = vpack.c.bf16 %v1615_v33, %v1615_v33 }
 0x1b5   :  { %v1616_v35 = vsel %vm1608_vm4, %v1601_v27, %v1612_v32 }
 0x1b6   :  { %v1620_v55 = vpack.c.bf16 %v1616_v35, %v1616_v35 }
 0x1b8   :  { %2090 = vmatprep.mubr.bf16.mxu1 %v1620_v55 }
 0x1b9   :  { %2091 = vmatmul.mubr.bf16.vlgmr.msra.gmra.mxu1 %v1619_v37 }
 0x22a   :  { %v2051_v48 = vpop.f32.mrf.mxu0 }
 0x22b   :  { %v2052_v56 = vadd.f32 %v2051_v48, %v1690_v53 }
 0x22c   :  { %v2053_v49 = vpop.f32.mrf.mxu0 }
 0x22d   :  { %v2054_v58 = vadd.f32 %v2053_v49, %v1694_v54 }
 0x22e   :  { %v2055_v50 = vpop.f32.mrf.mxu0 }
 0x230   :  { %v2056_v51 = vpop.f32.mrf.mxu0 }
 0x279   :  { %v2092_v57 = vpop.f32.mrf.mxu1 }
 0x27a   :  { %v2093_v59 = vadd.f32 %v2092_v57, %v2052_v56 }
 0x27b   :  { %v2094_v60 = vpop.f32.mrf.mxu1 }
 0x27c   :  { %vm2099_vm5 = vcmp.gt.f32.partialorder %v2093_v59, 0.0  ;;  %v2101_v61 = vmul.f32 0.2, %v2093_v59  ;;  %v2095_v62 = vadd.f32 %v2094_v60, %v2054_v58 }
 0x27d   :  { %v2096_v63 = vpop.f32.mrf.mxu1 }
 0x27e   :  { %vm2100_vm6 = vcmp.gt.f32.partialorder %v2095_v62, 0.0  ;;  %v2102_v0 = vmul.f32 0.2, %v2095_v62  ;;  %v2103_v1 = vsel %vm2099_vm5, %v2093_v59, %v2101_v61 }
 0x27f   :  { %v2097_v2 = vpop.f32.mrf.mxu1  ;;  %v2105_v5 = vpack.c.bf16 %v2103_v1, %v2103_v1 }
 0x280   :  { %v2104_v3 = vsel %vm2100_vm6, %v2095_v62, %v2102_v0 }
 0x281   :  { %v2106_v4 = vpack.c.bf16 %v2104_v3, %v2104_v3 }
 0x283   :  { %2274 = vmatprep.mubr.bf16.mxu0 %v2106_v4 }
 0x284   :  { %2275 = vmatmul.mubr.bf16.vlgmr.msra.gmra.mxu0 %v2105_v5 }
 0x344   :  { %v2592_v39 = vpop.f32.mrf.mxu0 }
 0x346   :  { %v2593_v16 = vpop.f32.mrf.mxu0 }
 0x347   :  { %v2594_v6 = vadd.f32 %v2593_v16, %v2592_v39 }
 0x348   :  { %v2595_v7 = vpop.f32.mrf.mxu0 }
 0x349   :  { %v2277_v10 = vadd.f32 %v2594_v6, %v2558_v18 }
 0x34a   :  { %v2596_v11 = vpop.f32.mrf.mxu0 }
 0x34b   :  { %v2575_v12 = vmul.f32 -1.442695, %v2277_v10 }
 0x34d   :  { %3014 = vpow2.f32 %v2575_v12 }
 0x35a   :  { %v3015_v13 = vpop.eup %3014 }
 0x35b   :  { %v2285_v14 = vadd.f32 1.0, %v3015_v13 }
 0x35d   :  { %3016 = vrcp.f32 %v2285_v14 }
 0x36a   :  { %v3017_v15 = vpop.eup %3016 }
 0x36b   :  { %v2288_v17 = vpack.c.bf16 %v3017_v15, %v3017_v15 }
 0x36d   :  { %2289 = vst [vmem:[%s3246_s7] sm:$0x3] %v2288_v17 }
 0x36e   :  { %2294 = vsyncpa [#allocation3], 1 }
 0x36f   :  { %2295 = vsyncpa [#allocation5], 1 }

</bundles_post_ra>
